<compile_context>
chip_gen: v7x
topology: tpu7x:2x2x1
jax: 0.10.0
libtpu: 0.0.40
codegen_flags: <defaults>
</compile_context>

<pallas_src>
import functools
from math import sqrt

import jax
import jax.numpy as jnp
from jax.experimental import pallas as pl
from jax.experimental.pallas import tpu as pltpu


def _ceil_to(x, m):
    return ((x + m - 1) // m) * m


def _pick_tile(d, candidates):
    for c in candidates:
        if d % c == 0:
            return c
    return d


def _sublane(dtype):
    # packed-dtype sublane minimum: f32 -> 8, bf16 -> 16, int8/fp8 -> 32.
    return max(8, 32 // max(1, jnp.dtype(dtype).itemsize))


def _default_vmem_limit_bytes():
    """Generation-aware per-TensorCore VMEM budget with headroom."""
    try:
        cap = int(pltpu.get_tpu_info().vmem_capacity_bytes)
    except Exception:
        cap = 64 * 1024 * 1024  # conservative: v7x per-TC physical VMEM
    return (cap * 3) // 4  # ~96 MiB on v5e/v6e, ~48 MiB on v7x


_BUFFERED_ONE_OK = None


def _buffered_one_supported():
    """Probe: does pl.BlockSpec(..., pipeline_mode=pl.Buffered(1)) lower here?"""
    global _BUFFERED_ONE_OK
    if _BUFFERED_ONE_OK is not None:
        return _BUFFERED_ONE_OK
    try:
        def k(x_ref, o_ref):
            o_ref[...] = x_ref[...] + 1.0

        out = pl.pallas_call(
            k,
            out_shape=jax.ShapeDtypeStruct((8, 128), jnp.float32),
            grid=(1,),
            in_specs=[pl.BlockSpec((8, 128), lambda i: (0, 0),
                                   pipeline_mode=pl.Buffered(1))],
            out_specs=pl.BlockSpec((8, 128), lambda i: (0, 0)),
        )(jnp.zeros((8, 128), jnp.float32))
        jax.block_until_ready(out)
        _BUFFERED_ONE_OK = True
    except Exception:
        _BUFFERED_ONE_OK = False
    return _BUFFERED_ONE_OK


# ---------------------------------------------------------------------------
# Fused whole-MLP kernel (small/medium MLPs: all padded weights fit VMEM).
# ---------------------------------------------------------------------------
def _fused_mlp_kernel(*refs):
    # refs = (x_ref, w0, b0, w1, b1, ..., o_ref)
    x_ref = refs[0]
    o_ref = refs[-1]
    wb = refs[1:-1]
    n_layers = len(wb) // 2

    h = x_ref[...]  # keep operands in native dtype -> bf16 MXU fast path
    for l in range(n_layers):
        w = wb[2 * l][...]
        b = wb[2 * l + 1][...]
        acc = jnp.dot(h, w, preferred_element_type=jnp.float32)
        acc = acc + b.astype(jnp.float32)
        # TODO(synk): apply `act` here if a non-None activation were passed
        # (the reference module defaults to act=None -> pure Linear stack).
        if l < n_layers - 1:
            h = acc.astype(w.dtype)  # cast back so the next dot stays on the fast path
        else:
            h = acc
    o_ref[...] = h.astype(o_ref.dtype)


def fused_mlp(x_p, params_p, out_dtype, *, bm, vmem_limit, single_buffer_weights):
    """x_p: [Bp, D0] (batch-padded only); params_p: list of (w [Din, Dout_p], b [1, Dout_p])."""
    Bp, D0 = x_p.shape
    DLp = params_p[-1][0].shape[1]

    flat_params = []
    in_specs = [pl.BlockSpec((bm, D0), lambda i: (i, 0))]
    for (w, b) in params_p:
        din, dout = w.shape
        flat_params += [w, b]
        if single_buffer_weights:
            # Constant index_map -> single buffer; halves resident weight VMEM.
            in_specs.append(pl.BlockSpec((din, dout), lambda i: (0, 0),
                                         pipeline_mode=pl.Buffered(1)))
            in_specs.append(pl.BlockSpec((1, dout), lambda i: (0, 0),
                                         pipeline_mode=pl.Buffered(1)))
        else:
            in_specs.append(pl.BlockSpec((din, dout), lambda i: (0, 0)))
            in_specs.append(pl.BlockSpec((1, dout), lambda i: (0, 0)))

    flops = 2 * Bp * sum(w.shape[0] * w.shape[1] for w, _ in params_p)
    bytes_accessed = (
        x_p.size * x_p.dtype.itemsize
        + sum(a.size * a.dtype.itemsize for a in flat_params)
        + Bp * DLp * jnp.dtype(out_dtype).itemsize
    )

    return pl.pallas_call(
        _fused_mlp_kernel,
        out_shape=jax.ShapeDtypeStruct((Bp, DLp), out_dtype),
        grid=(Bp // bm,),
        in_specs=in_specs,
        out_specs=pl.BlockSpec((bm, DLp), lambda i: (i, 0)),
        compiler_params=pltpu.CompilerParams(
            dimension_semantics=("parallel",),
            vmem_limit_bytes=vmem_limit,
        ),
        cost_estimate=pl.CostEstimate(
            flops=flops, transcendentals=0, bytes_accessed=bytes_accessed
        ),
    )(x_p, *flat_params)


# ---------------------------------------------------------------------------
# Tiled single-layer fallback (large layers): y = x @ W + b.
# ---------------------------------------------------------------------------
def _tiled_linear_kernel(x_ref, w_ref, b_ref, o_ref, acc_ref):
    k = pl.program_id(2)

    @pl.when(k == 0)
    def _():
        acc_ref[...] = jnp.zeros_like(acc_ref)

    acc_ref[...] += jnp.dot(
        x_ref[...], w_ref[...], preferred_element_type=jnp.float32
    )

    @pl.when(k == pl.num_programs(2) - 1)
    def _():
        # Bias added exactly once, in the finalize branch (f32 epilogue).
        o_ref[...] = (acc_ref[...] + b_ref[...].astype(jnp.float32)).astype(
            o_ref.dtype
        )


def tiled_linear(x_p, w_p, b_p, out_dtype, *, bm=None, vmem_limit=None):
    Bp, Kp = x_p.shape
    Np = w_p.shape[1]
    if bm is None or Bp % bm != 0:
        bm = _pick_tile(Bp, (512, 256, 128, 64, 32, 16, 8))
    bn = _pick_tile(Np, (512, 256, 128))
    bk = _pick_tile(Kp, (512, 256, 128))
    grid = (Bp // bm, Np // bn, Kp // bk)
    return pl.pallas_call(
        _tiled_linear_kernel,
        out_shape=jax.ShapeDtypeStruct((Bp, Np), out_dtype),
        grid=grid,
        in_specs=[
            pl.BlockSpec((bm, bk), lambda i, j, k: (i, k)),
            pl.BlockSpec((bk, bn), lambda i, j, k: (k, j)),
            pl.BlockSpec((1, bn), lambda i, j, k: (0, j)),
        ],
        out_specs=pl.BlockSpec((bm, bn), lambda i, j, k: (i, j)),
        scratch_shapes=[pltpu.VMEM((bm, bn), jnp.float32)],
        compiler_params=pltpu.CompilerParams(
            dimension_semantics=("parallel", "parallel", "arbitrary"),
            vmem_limit_bytes=vmem_limit,
        ),
        cost_estimate=pl.CostEstimate(
            flops=2 * Bp * Kp * Np,
            transcendentals=0,
            bytes_accessed=(
                x_p.size * x_p.dtype.itemsize
                + w_p.size * w_p.dtype.itemsize
                + b_p.size * b_p.dtype.itemsize
                + Bp * Np * jnp.dtype(out_dtype).itemsize
            ),
        ),
    )(x_p, w_p, b_p)


# ---------------------------------------------------------------------------
# Parameter init + forward wrapper.
# ---------------------------------------------------------------------------
def init_mlp_params(key, dims, dtype=jnp.float32):
    """nn.Linear-style init; weights stored transposed as [D_in, D_out]."""
    params = []
    for d_in, d_out in zip(dims[:-1], dims[1:]):
        key, kw, kb = jax.random.split(key, 3)
        bound = 1.0 / sqrt(d_in)
        w = jax.random.uniform(kw, (d_in, d_out), dtype, -bound, bound)
        b = jax.random.uniform(kb, (1, d_out), dtype, -bound, bound)
        params.append((w, b))
    return params


def make_mlp_forward(params, vmem_limit_bytes=None):
    dims = [params[0][0].shape[0]] + [w.shape[1] for w, _ in params]
    d0 = dims[0]
    padded_out = [_ceil_to(d, 128) for d in dims[1:]]
    # Input feature dim is left UNPADDED (full-dim block is exempt from the
    # 128 rule); subsequent D_in match the previous layer's padded D_out.
    padded_in = [d0] + padded_out[:-1]

    # Pre-pad weights/biases ONCE (zero padding -> padded lanes stay zero).
    params_p = []
    for (w, b), dip, dop in zip(params, padded_in, padded_out):
        wp = jnp.pad(w, ((0, dip - w.shape[0]), (0, dop - w.shape[1])))
        bp = jnp.pad(b, ((0, 0), (0, dop - b.shape[1])))
        params_p.append((wp, bp))

    weight_bytes = sum(
        w.size * w.dtype.itemsize + b.size * b.dtype.itemsize
        for w, b in params_p
    )

    if vmem_limit_bytes is None:
        vmem_limit_bytes = _default_vmem_limit_bytes()
    single_buf = _buffered_one_supported()
    weight_resident_bytes = weight_bytes * (1 if single_buf else 2)
    max_dim = max([d0] + padded_out)

    @jax.jit
    def forward(x, params_p):
        *lead, d_in = x.shape
        assert d_in == d0, "input feature dim mismatch"
        x2 = x.reshape((-1, d_in))
        B = x2.shape[0]
        sub = _sublane(x.dtype)

        # Fused-path batch tile: dtype-packed sublane multiple, capped at 256.
        bm = min(256, _ceil_to(B, sub))
        Bp = _ceil_to(B, bm)
        # v7x megacore: keep >= 2 parallel batch tiles when cleanly divisible.
        if Bp // bm < 2 and bm % (2 * sub) == 0:
            bm //= 2
            Bp = _ceil_to(B, bm)

        # Rough activation VMEM: x tile (double-buffered) + f32 intermediates
        # + output tile (double-buffered).
        act_bytes = 6 * bm * max_dim * 4
        use_fused = (weight_resident_bytes + act_bytes
                     <= vmem_limit_bytes - (2 << 20))

        if use_fused:
            x_p = x2 if Bp == B else jnp.pad(x2, ((0, Bp - B), (0, 0)))
            y_p = fused_mlp(x_p, params_p, x.dtype, bm=bm,
                            vmem_limit=vmem_limit_bytes,
                            single_buffer_weights=single_buf)
        else:
            # TODO(synk): replace this per-layer chain with a single
            # activation-resident kernel that streams each layer's weights
            # from HBM (pltpu.emit_pipeline), removing the inter-layer HBM
            # round-trips of the intermediate activations.
            bm_fb = 256 if B >= 256 else _ceil_to(B, sub)
            Bp_fb = _ceil_to(B, bm_fb)
            h = x2 if Bp_fb == B else jnp.pad(x2, ((0, Bp_fb - B), (0, 0)))
            for w_p, b_p in params_p:
                h = tiled_linear(h, w_p, b_p, x.dtype, bm=bm_fb,
                                 vmem_limit=vmem_limit_bytes)
            y_p = h

        y = y_p[:B, : dims[-1]]
        return y.reshape((*lead, dims[-1]))

    return functools.partial(forward, params_p=params_p)


if __name__ == "__main__":
    key = jax.random.PRNGKey(0)
    dims = [32, 64, 16]  # MLP([32, 64, 16]), act=None
    batch = 8

    key, kx = jax.random.split(key)
    x = jax.random.normal(kx, (batch, dims[0]), jnp.float32)
    params = init_mlp_params(key, dims)

    forward = make_mlp_forward(params)
    out = forward(x)
    jax.block_until_ready(out)

    # sanity: compare against plain-JAX reference
    ref = x
    for w, b in params:
        ref = ref @ w + b
    assert out.shape == (batch, dims[-1])
    assert jnp.allclose(out, ref, atol=1e-5, rtol=1e-5), float(
        jnp.max(jnp.abs(out - ref))
    )

    print("KERNEL_OK")
</pallas_src>

<mosaic_0001>
module attributes {stable_mosaic.version = 11 : i64} {
  func.func @k(%arg0: i32, %arg1: memref<8x128xf32, #tpu.memory_space<vmem>>, %arg2: memref<8x128xf32, #tpu.memory_space<vmem>>) attributes {dimension_semantics = [#tpu.dimension_semantics<arbitrary>], iteration_bounds = array<i64: 1>, scalar_prefetch = 0 : i64, scratch_operands = 0 : i64, tpu.core_type = #tpu.core_type<tc>, window_params = [{pipeline_mode = #tpu.pipeline_mode<synchronous>, transform_indices = @transform_0, window_bounds = array<i64: 8, 128>}, {pipeline_mode = #tpu.pipeline_mode<synchronous>, transform_indices = @transform_1, window_bounds = array<i64: 8, 128>}]} {
    %c0 = arith.constant 0 : index
    %c0_0 = arith.constant 0 : index
    %0 = vector.load %arg1[%c0, %c0_0] : memref<8x128xf32, #tpu.memory_space<vmem>>, vector<8x128xf32>
    %cst = arith.constant 1.000000e+00 : f32
    %1 = vector.broadcast %cst : f32 to vector<8x128xf32>
    %2 = arith.addf %0, %1 : vector<8x128xf32>
    %c0_1 = arith.constant 0 : index
    %c0_2 = arith.constant 0 : index
    %3 = vector.load %arg2[%c0_1, %c0_2] : memref<8x128xf32, #tpu.memory_space<vmem>>, vector<8x128xf32>
    tpu.vector_store %arg2[%c0_1, %c0_2], %2 {strides = array<i32>} : memref<8x128xf32, #tpu.memory_space<vmem>>, vector<8x128xf32>,
    return
  }
  func.func @transform_0(%arg0: i32) -> (i32, i32) {
    %c0_i32 = arith.constant 0 : i32
    %c0_i32_0 = arith.constant 0 : i32
    %c0_i32_1 = arith.constant 0 : i32
    return %c0_i32, %c0_i32_0 : i32, i32
  }
  func.func @transform_1(%arg0: i32) -> (i32, i32) {
    %c0_i32 = arith.constant 0 : i32
    %c0_i32_0 = arith.constant 0 : i32
    %c0_i32_1 = arith.constant 0 : i32
    return %c0_i32, %c0_i32_0 : i32, i32
  }
}

module attributes {stable_mosaic.version = 11 : i64} {
  func.func @_fused_mlp_kernel(%arg0: i32, %arg1: memref<8x32xf32, #tpu.memory_space<vmem>>, %arg2: memref<32x128xf32, #tpu.memory_space<vmem>>, %arg3: memref<1x128xf32, #tpu.memory_space<vmem>>, %arg4: memref<128x128xf32, #tpu.memory_space<vmem>>, %arg5: memref<1x128xf32, #tpu.memory_space<vmem>>, %arg6: memref<8x128xf32, #tpu.memory_space<vmem>>) attributes {dimension_semantics = [#tpu.dimension_semantics<parallel>], iteration_bounds = array<i64: 1>, scalar_prefetch = 0 : i64, scratch_operands = 0 : i64, tpu.core_type = #tpu.core_type<tc>, window_params = [{transform_indices = @transform_0, window_bounds = array<i64: 8, 32>}, {pipeline_mode = #tpu.pipeline_mode<synchronous>, transform_indices = @transform_1, window_bounds = array<i64: 32, 128>}, {pipeline_mode = #tpu.pipeline_mode<synchronous>, transform_indices = @transform_2, window_bounds = array<i64: 1, 128>}, {pipeline_mode = #tpu.pipeline_mode<synchronous>, transform_indices = @transform_3, window_bounds = array<i64: 128, 128>}, {pipeline_mode = #tpu.pipeline_mode<synchronous>, transform_indices = @transform_4, window_bounds = array<i64: 1, 128>}, {transform_indices = @transform_5, window_bounds = array<i64: 8, 128>}]} {
    %c0 = arith.constant 0 : index
    %c0_0 = arith.constant 0 : index
    %0 = vector.load %arg1[%c0, %c0_0] : memref<8x32xf32, #tpu.memory_space<vmem>>, vector<8x32xf32>
    %c0_1 = arith.constant 0 : index
    %c0_2 = arith.constant 0 : index
    %1 = vector.load %arg2[%c0_1, %c0_2] : memref<32x128xf32, #tpu.memory_space<vmem>>, vector<32x128xf32>
    %c0_3 = arith.constant 0 : index
    %c0_4 = arith.constant 0 : index
    %2 = vector.load %arg3[%c0_3, %c0_4] : memref<1x128xf32, #tpu.memory_space<vmem>>, vector<1x128xf32>
    %cst = arith.constant dense<0.000000e+00> : vector<8x128xf32>
    %3 = tpu.matmul %0, %1, %cst {dimension_numbers = #tpu.dot_dimension_numbers<[1], [0], [0], [1], [0, 0, 1, 1], [], []>} : vector<8x32xf32>, vector<32x128xf32>, vector<8x128xf32> -> vector<8x128xf32>
    %4 = vector.broadcast %2 : vector<1x128xf32> to vector<8x128xf32>
    %5 = arith.addf %3, %4 : vector<8x128xf32>
    %c0_5 = arith.constant 0 : index
    %c0_6 = arith.constant 0 : index
    %6 = vector.load %arg4[%c0_5, %c0_6] : memref<128x128xf32, #tpu.memory_space<vmem>>, vector<128x128xf32>
    %c0_7 = arith.constant 0 : index
    %c0_8 = arith.constant 0 : index
    %7 = vector.load %arg5[%c0_7, %c0_8] : memref<1x128xf32, #tpu.memory_space<vmem>>, vector<1x128xf32>
    %cst_9 = arith.constant dense<0.000000e+00> : vector<8x128xf32>
    %8 = tpu.matmul %5, %6, %cst_9 {dimension_numbers = #tpu.dot_dimension_numbers<[1], [0], [0], [1], [0, 0, 1, 1], [], []>} : vector<8x128xf32>, vector<128x128xf32>, vector<8x128xf32> -> vector<8x128xf32>
    %9 = vector.broadcast %7 : vector<1x128xf32> to vector<8x128xf32>
    %10 = arith.addf %8, %9 : vector<8x128xf32>
    %c0_10 = arith.constant 0 : index
    %c0_11 = arith.constant 0 : index
    %11 = vector.load %arg6[%c0_10, %c0_11] : memref<8x128xf32, #tpu.memory_space<vmem>>, vector<8x128xf32>
    tpu.vector_store %arg6[%c0_10, %c0_11], %10 {strides = array<i32>} : memref<8x128xf32, #tpu.memory_space<vmem>>, vector<8x128xf32>,
    return
  }
  func.func @transform_0(%arg0: i32) -> (i32, i32) {
    %c0_i32 = arith.constant 0 : i32
    %c0_i32_0 = arith.constant 0 : i32
    return %arg0, %c0_i32 : i32, i32
  }
  func.func @transform_1(%arg0: i32) -> (i32, i32) {
    %c0_i32 = arith.constant 0 : i32
    %c0_i32_0 = arith.constant 0 : i32
    %c0_i32_1 = arith.constant 0 : i32
    return %c0_i32, %c0_i32_0 : i32, i32
  }
  func.func @transform_2(%arg0: i32) -> (i32, i32) {
    %c0_i32 = arith.constant 0 : i32
    %c0_i32_0 = arith.constant 0 : i32
    %c0_i32_1 = arith.constant 0 : i32
    return %c0_i32, %c0_i32_0 : i32, i32
  }
  func.func @transform_3(%arg0: i32) -> (i32, i32) {
    %c0_i32 = arith.constant 0 : i32
    %c0_i32_0 = arith.constant 0 : i32
    %c0_i32_1 = arith.constant 0 : i32
    return %c0_i32, %c0_i32_0 : i32, i32
  }
  func.func @transform_4(%arg0: i32) -> (i32, i32) {
    %c0_i32 = arith.constant 0 : i32
    %c0_i32_0 = arith.constant 0 : i32
    %c0_i32_1 = arith.constant 0 : i32
    return %c0_i32, %c0_i32_0 : i32, i32
  }
  func.func @transform_5(%arg0: i32) -> (i32, i32) {
    %c0_i32 = arith.constant 0 : i32
    %c0_i32_0 = arith.constant 0 : i32
    return %arg0, %c0_i32 : i32, i32
  }
}

</mosaic_0001>

<bundles_post_ra>
// kernel: tpu_custom_call.1
= control target key start
LH: loop header
LB: loop body
LE: loop exit
PB: predicated region body
PF: predicated region fallthrough
CT: control target
= control target key end

     0   :  { %6 = vsyncpa [#allocation3], 0  ;;  %s125_s0 = inlined_call_operand.hbm [shape: f32[8,128], index: 0, kind: input, shape index: {}]   ;;  %s126_s1 = inlined_call_operand.hbm [shape: f32[8,128], index: 1, kind: output, shape index: {}]  }
   0x1   :  { %7 = vsyncpa [#allocation4], 0  ;;  %s89_s6 = smov [#allocation2]   ;;  %s41_s10 = scalar_lea.hbm %s125_s0, 128 }
   0x2   :  { %s14_s7 = sshll.u32 %s89_s6, 4  ;;  %p42_p0 = scmp.ne.s32.totalorder %s125_s0, %s41_s10  ;;  %s15_s7 = int_to_ptr.vmem [resolvable:$true] %s14_s7 }
   0x3   :  { %p45_p1 = scmp.lt.u32.totalorder %s41_s10, %s125_s0 }
   0x5   :  { %p47_p2 = pnand %p45_p1, %p42_p0 }
   0x7   :  { %50 = shalt.err (!%p47_p2)
}
   0x8   :  { %s51_s15 = scalar_lea.vmem %s15_s7, 128  ;;  %p56_p4 = scmp.lt.s32.totalorder %s15_s7, %s15_s7 }
   0x9   :  { %p52_p3 = scmp.ne.s32.totalorder %s15_s7, %s51_s15  ;;  %p57_p5 = scmp.lt.s32.totalorder %s51_s15, %s51_s15 }
   0xb   :  { %p58_p6 = por %p57_p5, %p56_p4 }
   0xd   :  { %p59_p7 = pnand %p58_p6, %p52_p3 }
   0xf   :  { %62 = shalt.err (!%p59_p7)
}
  0x10   :  { %17 = dma.hbm_to_vmem [thread:$0]  %s125_s0, 128, %s15_s7, [#allocation3]  }
  0x11   :  { %85 = dma.done.wait [#allocation3], 128  }
  0x12   :  { %86 = vsyncadd [#allocation3], 4294967168  ;;  %s90_s18 = smov [#allocation5]   ;;  %v21_v0 = vld [vmem:[#allocation2] sm:$0xff] }
  0x13   :  { %s30_s19 = sshll.u32 %s90_s18, 4  ;;  %v22_v1 = vadd.f32 1.0, %v21_v0  ;;  %s31_s19 = int_to_ptr.vmem [resolvable:$true] %s30_s19 }
  0x14   :  { %s63_s20 = scalar_lea.vmem %s31_s19, 128  ;;  %p68_p9 = scmp.lt.s32.totalorder %s31_s19, %s31_s19 }
  0x15   :  { %23 = vst [vmem:[#allocation5] sm:$0xff] %v22_v1  ;;  %p64_p8 = scmp.ne.s32.totalorder %s31_s19, %s63_s20  ;;  %p69_p10 = scmp.lt.s32.totalorder %s63_s20, %s63_s20 }
  0x17   :  { %p70_p11 = por %p69_p10, %p68_p9 }
  0x19   :  { %p71_p12 = pnand %p70_p11, %p64_p8 }
  0x1b   :  { %74 = shalt.err (!%p71_p12)
}
  0x1c   :  { %s75_s23 = scalar_lea.hbm %s126_s1, 128 }
  0x1d   :  { %p76_p13 = scmp.ne.s32.totalorder %s126_s1, %s75_s23  ;;  %p79_p0 = scmp.lt.u32.totalorder %s75_s23, %s126_s1 }
  0x1f   :  { %p81_p1 = pnand %p79_p0, %p76_p13 }
  0x21   :  { %84 = shalt.err (!%p81_p1)
}
  0x22   :  { %33 = dma.vmem_to_hbm [thread:$0]  %s31_s19, 128, %s126_s1, [#allocation4]  }
  0x23   :  { %87 = dma.done.wait [#allocation4], 128  }
  0x24   :  { %88 = vsyncadd [#allocation4], 4294967168 }
  0x25   :  { %37 = vsyncpa [#allocation3], 1 }
  0x26   :  { %38 = vsyncpa [#allocation4], 1 }

// kernel: forward.1
= control target key start
LH: loop header
LB: loop body
LE: loop exit
PB: predicated region body
PF: predicated region fallthrough
CT: control target
= control target key end

     0   :  { %10 = vsyncpa [#allocation3], 0  ;;  %s559_s0 = inlined_call_operand.hbm [shape: f32[8,32], index: 0, kind: input, shape index: {}]   ;;  %s560_s1 = inlined_call_operand.hbm [shape: f32[32,128], index: 1, kind: input, shape index: {}]   ;;  %s561_s2 = inlined_call_operand.vmem [shape: f32[1,128], index: 2, kind: input, shape index: {}]   ;;  %s562_s3 = inlined_call_operand.hbm [shape: f32[128,128], index: 3, kind: input, shape index: {}]   ;;  %s563_s4 = inlined_call_operand.vmem [shape: f32[1,128], index: 4, kind: input, shape index: {}]   ;;  %s564_s5 = inlined_call_operand.hbm [shape: f32[8,128], index: 5, kind: output, shape index: {}]  }
   0x1   :  { %11 = vsyncpa [#allocation6], 0 }
   0x2   :  { %12 = vsyncpa [#allocation4], 0  ;;  %s460_s18 = smov [#allocation5]   ;;  %s366_s22 = scalar_lea.hbm %s560_s1, 512 }
   0x3   :  { %s28_s19 = sshll.u32 %s460_s18, 4  ;;  %p367_p0 = scmp.ne.s32.totalorder %s560_s1, %s366_s22  ;;  %s29_s19 = int_to_ptr.vmem [resolvable:$true] %s28_s19 }
   0x4   :  { %p370_p1 = scmp.lt.u32.totalorder %s366_s22, %s560_s1 }
   0x6   :  { %p372_p2 = pnand %p370_p1, %p367_p0 }
   0x8   :  { %375 = shalt.err (!%p372_p2)
}
   0x9   :  { %s376_s27 = scalar_lea.vmem %s29_s19, 512  ;;  %p381_p4 = scmp.lt.s32.totalorder %s29_s19, %s29_s19 }
   0xa   :  { %p377_p3 = scmp.ne.s32.totalorder %s29_s19, %s376_s27  ;;  %p382_p5 = scmp.lt.s32.totalorder %s376_s27, %s376_s27 }
   0xc   :  { %p383_p6 = por %p382_p5, %p381_p4 }
   0xe   :  { %p384_p7 = pnand %p383_p6, %p377_p3 }
  0x10   :  { %387 = shalt.err (!%p384_p7)
}
  0x11   :  { %s461_s28 = smov 128   ;;  %s462_s29 = smov 8  }
  0x12   :  { %34 = dma.hbm_to_vmem [thread:$0]  %s560_s1, 512, %s29_s19, [#allocation6], %s461_s28, %s461_s28, %s462_s29  }
  0x13   :  { %s463_s7 = smov [#allocation2]   ;;  %s464_s9 = smov [#allocation7]  }
  0x14   :  { %s19_s8 = sshll.u32 %s463_s7, 4  ;;  %s42_s10 = sshll.u32 %s464_s9, 4  ;;  %s20_s8 = int_to_ptr.vmem [resolvable:$true] %s19_s8  ;;  %s43_s10 = int_to_ptr.vmem [resolvable:$true] %s42_s10 }
  0x15   :  { %s388_s13 = scalar_lea.hbm %s559_s0, 128 }
  0x16   :  { %p389_p8 = scmp.ne.s32.totalorder %s559_s0, %s388_s13  ;;  %p392_p9 = scmp.lt.u32.totalorder %s388_s13, %s559_s0 }
  0x18   :  { %p394_p10 = pnand %p392_p9, %p389_p8 }
  0x1a   :  { %397 = shalt.err (!%p394_p10)
}
  0x1b   :  { %s398_s1 = scalar_lea.vmem %s20_s8, 128  ;;  %p403_p12 = scmp.lt.s32.totalorder %s20_s8, %s20_s8 }
  0x1c   :  { %p399_p11 = scmp.ne.s32.totalorder %s20_s8, %s398_s1  ;;  %p404_p13 = scmp.lt.s32.totalorder %s398_s1, %s398_s1 }
  0x1e   :  { %p405_p0 = por %p404_p13, %p403_p12 }
  0x20   :  { %p406_p1 = pnand %p405_p0, %p399_p11 }
  0x22   :  { %409 = shalt.err (!%p406_p1)
}
  0x23   :  { %22 = dma.hbm_to_vmem [thread:$0]  %s559_s0, 128, %s20_s8, [#allocation3]  }
  0x24   :  { %s410_s22 = scalar_lea.hbm %s562_s3, 2048 }
  0x25   :  { %p411_p2 = scmp.ne.s32.totalorder %s562_s3, %s410_s22  ;;  %p414_p3 = scmp.lt.u32.totalorder %s410_s22, %s562_s3 }
  0x27   :  { %p416_p4 = pnand %p414_p3, %p411_p2 }
  0x29   :  { %419 = shalt.err (!%p416_p4)
}
  0x2a   :  { %s420_s27 = scalar_lea.vmem %s43_s10, 2048  ;;  %p425_p6 = scmp.lt.s32.totalorder %s43_s10, %s43_s10 }
  0x2b   :  { %p421_p5 = scmp.ne.s32.totalorder %s43_s10, %s420_s27  ;;  %p426_p7 = scmp.lt.s32.totalorder %s420_s27, %s420_s27 }
  0x2d   :  { %p427_p8 = por %p426_p7, %p425_p6 }
  0x2f   :  { %p428_p9 = pnand %p427_p8, %p421_p5 }
  0x31   :  { %431 = shalt.err (!%p428_p9)
}
  0x32   :  { %48 = dma.hbm_to_vmem [thread:$0]  %s562_s3, 2048, %s43_s10, [#allocation6], %s461_s28, %s461_s28, %s462_s29  }
  0x33   :  { %454 = dma.done.wait [#allocation3], 128  }
  0x34   :  { %455 = vsyncadd [#allocation3], 4294967168 }
  0x35   :  { %456 = dma.done.wait [#allocation6], 2560  }
  0x36   :  { %457 = vsyncadd [#allocation6], 4294964736  ;;  %v465_v0 = vmov 0.0|0.0   ;;  %vm466_vm0 = vmmov 0   ;;  %v467_v1 = vmov 0.0   ;;  %v61_v2 = vld [vmem:[#allocation5] sm:$0xff] }
  0x37   :  { %327 = vmatprep.subr.bf16.mxu0 %v465_v0  ;;  %289 = vmatprep.mubr.msk.f32.mxu0 %vm466_vm0, %v467_v1  ;;  %v62_v3 = vld [vmem:[#allocation5 + $0x8] sm:$0xff]  ;;  %v63_v4 = vld [vmem:[#allocation5 + $0x10] sm:$0xff]  ;;  %v64_v6 = vld [vmem:[#allocation5 + $0x18] sm:$0xff]  ;;  %vm72_vm1 = vcmask 261120   ;;  %s468_s7 = smov [#allocation8]  }
  0x38   :  { %333 = vmatprep.subr.bf16.mxu1 %v465_v0  ;;  %324 = vmatprep.mubr.msk.f32.mxu1 %vm466_vm0, %v467_v1  ;;  %v328_v5 = vpack.c.bf16 %v62_v3, %v61_v2  ;;  %v146_v7 = vld [vmem:[#allocation7] sm:$0xff]  ;;  %v147_v8 = vld [vmem:[#allocation7 + $0x8] sm:$0xff]  ;;  %v148_v9 = vld [vmem:[#allocation7 + $0x10] sm:$0xff]  ;;  %v331_v11 = vpack.c.bf16 %v64_v6, %v63_v4  ;;  %s246_s8 = sshll.u32 %s468_s7, 4  ;;  %s247_s8 = int_to_ptr.vmem [resolvable:$true] %s246_s8 }
  0x39   :  { %v149_v10 = vld [vmem:[#allocation7 + $0x18] sm:$0xff]  ;;  %v334_v12 = vpack.c.bf16 %v147_v8, %v146_v7  ;;  %v150_v14 = vld [vmem:[#allocation7 + $0x20] sm:$0xff]  ;;  %v151_v15 = vld [vmem:[#allocation7 + $0x28] sm:$0xff]  ;;  %s432_s9 = scalar_lea.vmem %s247_s8, 128  ;;  %p437_p11 = scmp.lt.s32.totalorder %s247_s8, %s247_s8 }
  0x3a   :  { %329 = vmatpush3.bf16.msra.mxu0 %v328_v5  ;;  %v337_v13 = vpack.c.bf16 %v149_v10, %v148_v9  ;;  %v60_v16 = vld [vmem:[#allocation2] sm:$0xff]  ;;  %v340_v17 = vpack.c.bf16 %v151_v15, %v150_v14  ;;  %v152_v18 = vld [vmem:[#allocation7 + $0x30] sm:$0xff]  ;;  %v154_v21 = vld [vmem:[#allocation7 + $0x40] sm:$0xff]  ;;  %p433_p10 = scmp.ne.s32.totalorder %s247_s8, %s432_s9  ;;  %p438_p12 = scmp.lt.s32.totalorder %s432_s9, %s432_s9 }
  0x3b   :  { %330 = vmatprep.subr.bf16.mxu0 %v465_v0  ;;  %335 = vmatpush3.bf16.msra.mxu1 %v334_v12  ;;  %v153_v19 = vld [vmem:[#allocation7 + $0x38] sm:$0xff]  ;;  %v155_v22 = vld [vmem:[#allocation7 + $0x48] sm:$0xff]  ;;  %v156_v24 = vld [vmem:[#allocation7 + $0x50] sm:$0xff] }
  0x3c   :  { %336 = vmatprep.subr.bf16.mxu1 %v465_v0  ;;  %v343_v20 = vpack.c.bf16 %v153_v19, %v152_v18  ;;  %v346_v23 = vpack.c.bf16 %v155_v22, %v154_v21  ;;  %v157_v25 = vld [vmem:[#allocation7 + $0x58] sm:$0xff]  ;;  %v158_v27 = vld [vmem:[#allocation7 + $0x60] sm:$0xff]  ;;  %v159_v28 = vld [vmem:[#allocation7 + $0x68] sm:$0xff]  ;;  %p439_p13 = por %p438_p12, %p437_p11 }
  0x3d   :  { %v349_v26 = vpack.c.bf16 %v157_v25, %v156_v24  ;;  %v352_v29 = vpack.c.bf16 %v159_v28, %v158_v27  ;;  %v160_v30 = vld [vmem:[#allocation7 + $0x70] sm:$0xff]  ;;  %v161_v31 = vld [vmem:[#allocation7 + $0x78] sm:$0xff] }
  0x3e   :  { %332 = vmatpush3.bf16.msra.mxu0 %v331_v11  ;;  %v355_v32 = vpack.c.bf16 %v161_v31, %v160_v30  ;;  %v256_v33 = vld [vmem:[%s561_s2] ss:$0 sm:$0xff]  ;;  %p440_p0 = pnand %p439_p13, %p433_p10 }
  0x3f   :  { %338 = vmatpush3.bf16.msra.mxu1 %v337_v13  ;;  %v258_v37 = vld [vmem:[%s563_s4] ss:$0 sm:$0xff] }
  0x40   :  { %339 = vmatprep.subr.bf16.mxu1 %v465_v0 }
  0x41   :  { %290 = vmatmul.mubr.msk.f32.vlgmr.msra.gmra.mrb[0].mxu0 %vm72_vm1, %v60_v16 }
  0x43   :  { %341 = vmatpush3.bf16.msra.mxu1 %v340_v17 }
  0x44   :  { %342 = vmatprep.subr.bf16.mxu1 %v465_v0 }
  0x47   :  { %344 = vmatpush3.bf16.msra.mxu1 %v343_v20 }
  0x48   :  { %345 = vmatprep.subr.bf16.mxu1 %v465_v0 }
  0x4b   :  { %347 = vmatpush3.bf16.msra.mxu1 %v346_v23 }
  0x4c   :  { %348 = vmatprep.subr.bf16.mxu1 %v465_v0 }
  0x4f   :  { %350 = vmatpush3.bf16.msra.mxu1 %v349_v26 }
  0x50   :  { %351 = vmatprep.subr.bf16.mxu1 %v465_v0 }
  0x53   :  { %353 = vmatpush3.bf16.msra.mxu1 %v352_v29 }
  0x54   :  { %354 = vmatprep.subr.bf16.mxu1 %v465_v0 }
  0x57   :  { %356 = vmatpush3.bf16.msra.mxu1 %v355_v32 }
 0x114   :  { %v142_v34 = vpop.f32.mrb[0].mxu0 }
 0x115   :  { %v143_v35 = vadd.f32 %v256_v33, %v142_v34  ;;  %v291_v36 = vpop.f32.mrb[1].mxu0 }
 0x117   :  { %325 = vmatmul.mubr.f32.vlgmr.msra.gmra.mrb[0].mxu1 %v143_v35 }
 0x1ea   :  { %v235_v38 = vpop.f32.mrb[0].mxu1 }
 0x1eb   :  { %v236_v39 = vadd.f32 %v258_v37, %v235_v38  ;;  %v326_v40 = vpop.f32.mrb[1].mxu1 }
 0x1ed   :  { %239 = vst [vmem:[#allocation8] sm:$0xff] %v236_v39 }
 0x1ee   :  { %443 = shalt.err (!%p440_p0)
}
 0x1ef   :  { %s444_s11 = scalar_lea.hbm %s564_s5, 128 }
 0x1f0   :  { %p445_p1 = scmp.ne.s32.totalorder %s564_s5, %s444_s11  ;;  %p448_p2 = scmp.lt.u32.totalorder %s444_s11, %s564_s5 }
 0x1f2   :  { %p450_p3 = pnand %p448_p2, %p445_p1 }
 0x1f4   :  { %453 = shalt.err (!%p450_p3)
}
 0x1f5   :  { %249 = dma.vmem_to_hbm [thread:$0]  %s247_s8, 128, %s564_s5, [#allocation4]  }
 0x1f6   :  { %458 = dma.done.wait [#allocation4], 128  }
 0x1f7   :  { %459 = vsyncadd [#allocation4], 4294967168 }
 0x1f8   :  { %253 = vsyncpa [#allocation3], 1 }
 0x1f9   :  { %254 = vsyncpa [#allocation6], 1 }
 0x1fa   :  { %255 = vsyncpa [#allocation4], 1 }

</bundles_post_ra>
